<compile_context>
chip_gen: v5e
topology: v5e:2x2
jax: 0.10.0
libtpu: 0.0.40
codegen_flags: <defaults>
</compile_context>

<pallas_src>
import functools

import jax
import jax.numpy as jnp
from jax.experimental import pallas as pl
from jax.experimental.pallas import tpu as pltpu

LN_EPS = 1e-5   # nn.LayerNorm default eps
BN_EPS = 1e-5   # nn.BatchNorm2d default eps


# ----------------------------------------------------------------------------
# shared math helpers (used both inside kernels and by the pure-JAX reference)
# ----------------------------------------------------------------------------
def _layernorm(x, g, b):
    mu = jnp.mean(x, axis=-1, keepdims=True)
    var = jnp.mean((x - mu) ** 2, axis=-1, keepdims=True)
    return (x - mu) * jax.lax.rsqrt(var + LN_EPS) * g + b


def _gelu_exact(x):
    # nn.GELU default = exact erf-based GELU
    return 0.5 * x * (1.0 + jax.lax.erf(x * 0.7071067811865476))


# ----------------------------------------------------------------------------
# Pallas kernel A (fused): eval-BatchNorm (folded) + ReLU + 1x1 conv for BOTH
# feature_proj and feature_linear in a single pass over the feature tensor.
# ----------------------------------------------------------------------------
def _bn_relu_conv_fused_kernel(x_ref, s_ref, t_ref, w_ref, o_ref):
    x = x_ref[...]                                   # (TR, Cin)
    s = s_ref[...]                                   # (2, Cin)
    t = t_ref[...]                                   # (2, Cin)
    w = w_ref[...]                                   # (2, Cin, Dout)
    dout = w.shape[-1]
    yp = jnp.maximum(x * s[0:1] + t[0:1], 0.0)       # BN(eval)+ReLU, proj branch
    yl = jnp.maximum(x * s[1:2] + t[1:2], 0.0)       # BN(eval)+ReLU, linear branch
    o_ref[:, :dout] = jnp.dot(yp, w[0], preferred_element_type=jnp.float32)
    o_ref[:, dout:] = jnp.dot(yl, w[1], preferred_element_type=jnp.float32)


def bn_relu_conv1x1_fused(x, scales, shifts, weights, block_rows=512):
    """x: (R, Cin); scales/shifts: (2, Cin); weights: (2, Cin, Dout) -> (R, 2*Dout)."""
    R, Cin = x.shape
    Dout = weights.shape[-1]
    TR = min(block_rows, R)
    TR = max(8, (TR // 8) * 8)                       # keep sublane-aligned tiles
    Rp = pl.cdiv(R, TR) * TR
    if Rp != R:
        x = jnp.pad(x, ((0, Rp - R), (0, 0)))
    out = pl.pallas_call(
        _bn_relu_conv_fused_kernel,
        out_shape=jax.ShapeDtypeStruct((Rp, 2 * Dout), jnp.float32),
        grid=(Rp // TR,),
        in_specs=[
            pl.BlockSpec((TR, Cin), lambda i: (i, 0)),
            pl.BlockSpec((2, Cin), lambda i: (0, 0)),
            pl.BlockSpec((2, Cin), lambda i: (0, 0)),
            pl.BlockSpec((2, Cin, Dout), lambda i: (0, 0, 0)),
        ],
        out_specs=pl.BlockSpec((TR, 2 * Dout), lambda i: (i, 0)),
        compiler_params=pltpu.CompilerParams(dimension_semantics=("parallel",)),
    )(x, scales, shifts, weights)
    return out[:R]


# ----------------------------------------------------------------------------
# Pallas kernel B: the whole CrossAttention block, grid = (batch, Q-tile).
# ----------------------------------------------------------------------------
def _cross_attention_kernel(heads, dim_head,
                            q_ref, k_ref, v_ref, skip_ref,
                            dvec_ref, mvec_ref, b1_ref,
                            wqkv_ref, wp_ref, w1_ref, w2_ref,
                            out_ref):
    _, N, TQ, dim = q_ref.shape
    K = k_ref.shape[2]
    scale = dim_head ** (-0.5)

    # --- unpack packed parameter vectors (one (12,dim) + one (3,MD) ref) ---
    dv = dvec_ref[...]                               # (12, dim)
    mv = mvec_ref[...]                               # (3, MD)
    lnq_g, lnq_b = dv[0:1], dv[1:2]
    lnk_g, lnk_b = dv[2:3], dv[3:4]
    lnv_g, lnv_b = dv[4:5], dv[5:6]
    bp = dv[6:7]
    pre_g, pre_b = dv[7:8], dv[8:9]
    b2 = dv[9:10]
    post_g, post_b = dv[10:11], dv[11:12]
    bq, bk, bv = mv[0:1], mv[1:2], mv[2:3]

    wqkv = wqkv_ref[...]                             # (3, dim, MD)
    wq, wk, wv = wqkv[0], wqkv[1], wqkv[2]
    wpa = wp_ref[...]                                # (MD, dim)

    # --- LayerNorm + to_q / to_k / to_v, batched over all cameras (one matmul each) ---
    qn = _layernorm(q_ref[0].reshape(N * TQ, dim), lnq_g, lnq_b)
    q_lin = (jnp.dot(qn, wq, preferred_element_type=jnp.float32) + bq) * scale
    q_lin = q_lin.reshape(N, TQ, heads * dim_head)   # scale folded into q

    kn = _layernorm(k_ref[0].reshape(N * K, dim), lnk_g, lnk_b)
    k_lin = (jnp.dot(kn, wk, preferred_element_type=jnp.float32) + bk)
    k_lin = k_lin.reshape(N, K, heads * dim_head)

    vn = _layernorm(v_ref[0].reshape(N * K, dim), lnv_g, lnv_b)
    v_lin = (jnp.dot(vn, wv, preferred_element_type=jnp.float32) + bv)
    v_lin = v_lin.reshape(N, K, heads * dim_head)

    # --- per-head attention; cameras batched in a single einsum, softmax over the
    #     concatenated (cam, K) axis computed separably (global max / global sum),
    #     head-concat folded into row-slices of the projection weight. ---
    z = None
    for h in range(heads):
        sl = slice(h * dim_head, (h + 1) * dim_head)
        qh = q_lin[:, :, sl]                         # (N, TQ, dh)
        kh = k_lin[:, :, sl]                         # (N, K, dh)
        vh = v_lin[:, :, sl]                         # (N, K, dh)

        s = jnp.einsum('nqd,nkd->nqk', qh, kh,
                       preferred_element_type=jnp.float32)      # (N, TQ, K)

        m_cam = jnp.max(s, axis=2, keepdims=True)                # (N, TQ, 1)
        m = m_cam[0]
        for n in range(1, N):
            m = jnp.maximum(m, m_cam[n])                         # global max over (cam, K)

        p = jnp.exp(s - m)                                        # (N, TQ, K)

        l_cam = jnp.sum(p, axis=2, keepdims=True)                 # (N, TQ, 1)
        l = l_cam[0]
        for n in range(1, N):
            l = l + l_cam[n]                                      # global sum over (cam, K)

        pv = jnp.einsum('nqk,nkd->nqd', p, vh,
                        preferred_element_type=jnp.float32)       # (N, TQ, dh)
        ah = pv[0]
        for n in range(1, N):
            ah = ah + pv[n]                                       # sum over cameras
        ah = ah * pl.reciprocal(l, approx=True)                   # softmax normalize (EUP)

        piece = jnp.dot(ah, wpa[sl, :], preferred_element_type=jnp.float32)  # (TQ, dim)
        z = piece if z is None else z + piece

    # --- proj bias + skip + prenorm + MLP + postnorm ---
    z = z + bp + skip_ref[0]
    z = _layernorm(z, pre_g, pre_b)
    h1 = _gelu_exact(jnp.dot(z, w1_ref[...], preferred_element_type=jnp.float32)
                     + b1_ref[...])
    z = z + jnp.dot(h1, w2_ref[...], preferred_element_type=jnp.float32) + b2
    z = _layernorm(z, post_g, post_b)
    out_ref[0] = z


def cross_attention_pallas(q, k, v, skip, p, heads, dim_head):
    """q: (B,N,Q,dim)  k,v: (B,N,K,dim)  skip: (B,Q,dim) -> (B,Q,dim)."""
    B, N, Q, dim = q.shape
    K = k.shape[2]
    MD = heads * dim_head
    TQ = 128 if (Q % 128 == 0) else Q                 # Q-tile grid axis

    # Pack the many tiny per-tensor vectors into a few stacked arrays.
    dvecs = jnp.concatenate([p['lnq_g'], p['lnq_b'], p['lnk_g'], p['lnk_b'],
                             p['lnv_g'], p['lnv_b'], p['bp'], p['pre_g'], p['pre_b'],
                             p['b2'], p['post_g'], p['post_b']], axis=0)   # (12, dim)
    mvecs = jnp.concatenate([p['bq'], p['bk'], p['bv']], axis=0)           # (3, MD)
    wqkv = jnp.stack([p['wq'], p['wk'], p['wv']], axis=0)                  # (3, dim, MD)

    big = [dvecs, mvecs, p['b1'], wqkv, p['wp'], p['w1'], p['w2']]

    def wspec(arr):
        return pl.BlockSpec(arr.shape, lambda b, qt, n=arr.ndim: (0,) * n)

    in_specs = [
        pl.BlockSpec((1, N, TQ, dim), lambda b, qt: (b, 0, qt, 0)),
        pl.BlockSpec((1, N, K, dim), lambda b, qt: (b, 0, 0, 0)),
        pl.BlockSpec((1, N, K, dim), lambda b, qt: (b, 0, 0, 0)),
        pl.BlockSpec((1, TQ, dim), lambda b, qt: (b, qt, 0)),
    ] + [wspec(a) for a in big]

    kernel = functools.partial(_cross_attention_kernel, heads, dim_head)

    return pl.pallas_call(
        kernel,
        out_shape=jax.ShapeDtypeStruct((B, Q, dim), jnp.float32),
        grid=(B, Q // TQ),
        in_specs=in_specs,
        out_specs=pl.BlockSpec((1, TQ, dim), lambda b, qt: (b, qt, 0)),
        compiler_params=pltpu.CompilerParams(
            dimension_semantics=("parallel", "parallel"),
            vmem_limit_bytes=32 * 1024 * 1024),
    )(q, k, v, skip, *big)


# ----------------------------------------------------------------------------
# pure-JAX reference for the attention block (correctness check only)
# ----------------------------------------------------------------------------
def cross_attention_reference(q, k, v, skip, p, heads, dim_head):
    B, N, Q, dim = q.shape
    K = k.shape[2]
    MD = heads * dim_head
    scale = dim_head ** (-0.5)
    qn = _layernorm(q, p['lnq_g'][0], p['lnq_b'][0]) @ p['wq'] + p['bq'][0]
    kn = _layernorm(k, p['lnk_g'][0], p['lnk_b'][0]) @ p['wk'] + p['bk'][0]
    vn = _layernorm(v, p['lnv_g'][0], p['lnv_b'][0]) @ p['wv'] + p['bv'][0]
    qh = qn.reshape(B, N, Q, heads, dim_head)
    kh = kn.reshape(B, N, K, heads, dim_head)
    vh = vn.reshape(B, N * K, heads, dim_head)
    dot = scale * jnp.einsum('bnqhd,bnkhd->bhnqk', qh, kh)
    dot = dot.transpose(0, 1, 3, 2, 4).reshape(B, heads, Q, N * K)
    att = jax.nn.softmax(dot, axis=-1)
    a = jnp.einsum('bhqk,bkhd->bqhd', att, vh).reshape(B, Q, MD)
    z = a @ p['wp'] + p['bp'][0]
    z = z + skip
    z = _layernorm(z, p['pre_g'][0], p['pre_b'][0])
    h1 = _gelu_exact(z @ p['w1'] + p['b1'][0])
    z = z + h1 @ p['w2'] + p['b2'][0]
    z = _layernorm(z, p['post_g'][0], p['post_b'][0])
    return z


# ----------------------------------------------------------------------------
# geometry helpers (match the PyTorch module)
# ----------------------------------------------------------------------------
def generate_grid(h, w):
    xs = jnp.linspace(0.0, 1.0, w)
    ys = jnp.linspace(0.0, 1.0, h)
    gx, gy = jnp.meshgrid(xs, ys)                        # 'xy' indexing -> (h, w)
    grid = jnp.stack([gx, gy, jnp.ones((h, w))], axis=0)   # (3, h, w), 3rd channel = 1
    return grid[None]                                     # (1, 3, h, w)


def get_view_matrix(h=200, w=200, h_meters=100.0, w_meters=100.0, offset=0.0):
    sh = h / h_meters
    sw = w / w_meters
    return [[0.0, -sw, w / 2.0], [-sh, 0.0, h * offset + h / 2.0], [0.0, 0.0, 1.0]]


def make_bev_embedding(key, dim, sigma, bev_height, bev_width, h_meters, w_meters,
                       offset, decoder_blocks, num_clusters):
    h = bev_height // 2 ** len(decoder_blocks)
    w = bev_width // 2 ** len(decoder_blocks)
    grid = generate_grid(h, w)[0]                        # (3, h, w)
    grid = grid.at[0].multiply(bev_width)
    grid = grid.at[1].multiply(bev_height)
    V = jnp.array(get_view_matrix(bev_height, bev_width, h_meters, w_meters, offset),
                  jnp.float32)
    V_inv = jnp.linalg.inv(V)
    grid = (V_inv @ grid.reshape(3, h * w)).reshape(3, h, w)
    embeddings = sigma * jax.random.normal(key, (num_clusters, dim, h, w), jnp.float32)
    return {'grid': grid, 'embeddings': embeddings}


# ----------------------------------------------------------------------------
# parameter init (deterministic, synthetic)
# ----------------------------------------------------------------------------
def init_cross_view_attention(key, feat_height, feat_width, feat_dim, dim,
                              image_height, image_width, heads, dim_head):
    keys = iter(jax.random.split(key, 40))

    def nrm(shape, s=0.1):
        return s * jax.random.normal(next(keys), shape, jnp.float32)

    MD = heads * dim_head
    image_plane = generate_grid(feat_height, feat_width)[None]   # (1,1,3,h,w)
    image_plane = image_plane.at[:, :, 0].multiply(image_width)
    image_plane = image_plane.at[:, :, 1].multiply(image_height)

    params = dict(
        image_plane=image_plane,
        # 1x1 conv weights stored as (Cout, Cin)
        w_cam=nrm((dim, 4)), w_img=nrm((dim, 4)),
        w_bev=nrm((dim, 2)), b_bev=nrm((dim,)),
        # feature_linear: BN(feat_dim) + ReLU + Conv(feat_dim -> dim, no bias)
        fl_gamma=1.0 + nrm((feat_dim,)), fl_beta=nrm((feat_dim,)),
        fl_mean=nrm((feat_dim,)), fl_var=1.0 + jnp.abs(nrm((feat_dim,))),
        w_fl=nrm((dim, feat_dim)),
        # feature_proj: same structure
        fp_gamma=1.0 + nrm((feat_dim,)), fp_beta=nrm((feat_dim,)),
        fp_mean=nrm((feat_dim,)), fp_var=1.0 + jnp.abs(nrm((feat_dim,))),
        w_fp=nrm((dim, feat_dim)),
        # CrossAttention (qkv_bias=True)
        lnq_g=(1.0 + nrm((dim,))).reshape(1, dim), lnq_b=nrm((dim,)).reshape(1, dim),
        wq=nrm((dim, MD)), bq=nrm((MD,)).reshape(1, MD),
        lnk_g=(1.0 + nrm((dim,))).reshape(1, dim), lnk_b=nrm((dim,)).reshape(1, dim),
        wk=nrm((dim, MD)), bk=nrm((MD,)).reshape(1, MD),
        lnv_g=(1.0 + nrm((dim,))).reshape(1, dim), lnv_b=nrm((dim,)).reshape(1, dim),
        wv=nrm((dim, MD)), bv=nrm((MD,)).reshape(1, MD),
        wp=nrm((MD, dim)), bp=nrm((dim,)).reshape(1, dim),
        pre_g=(1.0 + nrm((dim,))).reshape(1, dim), pre_b=nrm((dim,)).reshape(1, dim),
        w1=nrm((dim, 2 * dim)), b1=nrm((2 * dim,)).reshape(1, 2 * dim),
        w2=nrm((2 * dim, dim)), b2=nrm((dim,)).reshape(1, dim),
        post_g=(1.0 + nrm((dim,))).reshape(1, dim), post_b=nrm((dim,)).reshape(1, dim),
    )
    return params


# ----------------------------------------------------------------------------
# CrossViewAttention.forward
# ----------------------------------------------------------------------------
def cross_view_attention_forward(params, bev, x, feature, I_inv, E_inv, cluster_ids,
                                 heads, dim_head, skip=True, use_pallas=True):
    B, N, feat_dim, fh, fw = feature.shape
    _, dim, H, W = x.shape
    P = fh * fw
    Q = H * W

    # --- camera / image-plane geometric embeddings (tiny matmuls; plain-JAX glue) ---
    c = E_inv[..., -1]                                               # (B, N, 4)
    c_embed = jnp.einsum('oc,bnc->bno', params['w_cam'], c)          # (B, N, dim)

    pixel_flat = params['image_plane'][0, 0].reshape(3, P)           # (3, P)
    cam = jnp.einsum('bnij,jp->bnip', I_inv, pixel_flat)             # (B, N, 3, P)
    cam = jnp.concatenate([cam, jnp.ones((B, N, 1, P), cam.dtype)], axis=2)
    d = jnp.einsum('bnij,bnjp->bnip', E_inv, cam)                    # (B, N, 4, P)
    d_embed = jnp.einsum('oc,bncp->bnop', params['w_img'], d)        # (B, N, dim, P)
    img_embed = d_embed - c_embed[..., None]
    img_embed = img_embed / (jnp.linalg.norm(img_embed, axis=2, keepdims=True) + 1e-7)

    w_embed = jnp.einsum('oc,chw->ohw', params['w_bev'], bev['grid'][:2]) \
        + params['b_bev'][:, None, None]                             # (dim, H, W)
    bev_embed = w_embed.reshape(1, 1, dim, Q) - c_embed[..., None]   # (B, N, dim, Q)
    bev_embed = bev_embed / (jnp.linalg.norm(bev_embed, axis=2, keepdims=True) + 1e-7)
    query_pos = bev_embed.reshape(B, N, dim, H, W)

    # --- fused feature_proj + feature_linear (Pallas kernel A) ---
    feat_rows = feature.transpose(0, 1, 3, 4, 2).reshape(B * N * P, feat_dim)

    def bn_fold(gamma, beta, mean, var):
        s = gamma / jnp.sqrt(var + BN_EPS)
        return s, beta - mean * s

    s_p, t_p = bn_fold(params['fp_gamma'], params['fp_beta'],
                       params['fp_mean'], params['fp_var'])
    s_l, t_l = bn_fold(params['fl_gamma'], params['fl_beta'],
                       params['fl_mean'], params['fl_var'])
    scales = jnp.stack([s_p, s_l])                                   # (2, Cin)
    shifts = jnp.stack([t_p, t_l])                                   # (2, Cin)
    w_both = jnp.stack([params['w_fp'].T, params['w_fl'].T])         # (2, Cin, dim)

    if use_pallas:
        both = bn_relu_conv1x1_fused(feat_rows, scales, shifts, w_both)   # (R, 2*dim)
    else:
        yp = jnp.maximum(feat_rows * s_p + t_p, 0.0) @ w_both[0]
        yl = jnp.maximum(feat_rows * s_l + t_l, 0.0) @ w_both[1]
        both = jnp.concatenate([yp, yl], axis=-1)
    key_feat = both[:, :dim].reshape(B * N, P, dim)
    val_feat = both[:, dim:].reshape(B * N, P, dim)

    img_embed_cl = img_embed.transpose(0, 1, 3, 2).reshape(B * N, P, dim)
    key_flat = img_embed_cl + key_feat                               # (BN, P, dim)

    # --- query = positional embedding + cluster prior ---
    prior = bev['embeddings'][cluster_ids]                           # (B, N, dim, H, W)
    query = query_pos + prior

    # --- pack channels-last for the attention kernel ---
    q_in = query.reshape(B, N, dim, Q).transpose(0, 1, 3, 2)         # (B, N, Q, dim)
    k_in = key_flat.reshape(B, N, P, dim)                            # (B, N, K, dim)
    v_in = val_feat.reshape(B, N, P, dim)                            # (B, N, K, dim)
    if skip:
        skip_in = x.reshape(B, dim, Q).transpose(0, 2, 1)            # (B, Q, dim)
    else:
        skip_in = jnp.zeros((B, Q, dim), x.dtype)

    if use_pallas:
        z = cross_attention_pallas(q_in, k_in, v_in, skip_in, params, heads, dim_head)
    else:
        z = cross_attention_reference(q_in, k_in, v_in, skip_in, params, heads, dim_head)

    return z.transpose(0, 2, 1).reshape(B, dim, H, W)                # NCHW output


# ----------------------------------------------------------------------------
if __name__ == "__main__":
    B, N = 2, 2                     # batch, cameras
    feat_dim, dim = 16, 32
    heads, dim_head = 4, 8
    fh, fw = 8, 8                   # image-feature spatial dims (K per cam = 64)
    image_height, image_width = 32, 32
    bev_height = bev_width = 32
    decoder_blocks = [1, 1]         # -> BEV grid 8x8 (Q = 64)
    H = W = bev_height // 2 ** len(decoder_blocks)
    num_clusters = 4

    key = jax.random.PRNGKey(0)
    k_bev, k_par, k_x, k_feat, k_I, k_E, k_cid = jax.random.split(key, 7)

    bev = make_bev_embedding(k_bev, dim, 1.0, bev_height, bev_width, 100.0, 100.0, 0.0,
                             decoder_blocks, num_clusters)
    params = init_cross_view_attention(k_par, fh, fw, feat_dim, dim,
                                       image_height, image_width, heads, dim_head)

    x = jax.random.normal(k_x, (B, dim, H, W), jnp.float32)
    feature = jax.random.normal(k_feat, (B, N, feat_dim, fh, fw), jnp.float32)
    I_inv = jnp.eye(3, dtype=jnp.float32)[None, None] \
        + 0.05 * jax.random.normal(k_I, (B, N, 3, 3), jnp.float32)
    E_inv = jnp.eye(4, dtype=jnp.float32)[None, None] \
        + 0.05 * jax.random.normal(k_E, (B, N, 4, 4), jnp.float32)
    cluster_ids = jax.random.randint(k_cid, (B, N), 0, num_clusters)

    out = cross_view_attention_forward(params, bev, x, feature, I_inv, E_inv, cluster_ids,
                                       heads, dim_head, skip=True, use_pallas=True)
    out = jax.block_until_ready(out)

    ref = cross_view_attention_forward(params, bev, x, feature, I_inv, E_inv, cluster_ids,
                                       heads, dim_head, skip=True, use_pallas=False)
    ref = jax.block_until_ready(ref)

    assert out.shape == (B, dim, H, W)
    max_diff = float(jnp.max(jnp.abs(out - ref)))
    assert max_diff < 5e-2, f"kernel/reference mismatch: max |diff| = {max_diff}"
    print("KERNEL_OK")
</pallas_src>

<mosaic_0001>
module attributes {stable_mosaic.version = 11 : i64} {
  func.func @_bn_relu_conv_fused_kernel(%arg0: i32, %arg1: memref<256x16xf32, #tpu.memory_space<vmem>>, %arg2: memref<2x16xf32, #tpu.memory_space<vmem>>, %arg3: memref<2x16xf32, #tpu.memory_space<vmem>>, %arg4: memref<2x16x32xf32, #tpu.memory_space<vmem>>, %arg5: memref<256x64xf32, #tpu.memory_space<vmem>>) attributes {dimension_semantics = [#tpu.dimension_semantics<parallel>], iteration_bounds = array<i64: 1>, scalar_prefetch = 0 : i64, scratch_operands = 0 : i64, tpu.core_type = #tpu.core_type<tc>, window_params = [{transform_indices = @transform_0, window_bounds = array<i64: 256, 16>}, {pipeline_mode = #tpu.pipeline_mode<synchronous>, transform_indices = @transform_1, window_bounds = array<i64: 2, 16>}, {pipeline_mode = #tpu.pipeline_mode<synchronous>, transform_indices = @transform_2, window_bounds = array<i64: 2, 16>}, {pipeline_mode = #tpu.pipeline_mode<synchronous>, transform_indices = @transform_3, window_bounds = array<i64: 2, 16, 32>}, {transform_indices = @transform_4, window_bounds = array<i64: 256, 64>}]} {
    %c0 = arith.constant 0 : index
    %c0_0 = arith.constant 0 : index
    %0 = vector.load %arg1[%c0, %c0_0] : memref<256x16xf32, #tpu.memory_space<vmem>>, vector<256x16xf32>
    %c0_1 = arith.constant 0 : index
    %c0_2 = arith.constant 0 : index
    %1 = vector.load %arg2[%c0_1, %c0_2] : memref<2x16xf32, #tpu.memory_space<vmem>>, vector<2x16xf32>
    %c0_3 = arith.constant 0 : index
    %c0_4 = arith.constant 0 : index
    %2 = vector.load %arg3[%c0_3, %c0_4] : memref<2x16xf32, #tpu.memory_space<vmem>>, vector<2x16xf32>
    %c0_5 = arith.constant 0 : index
    %c0_6 = arith.constant 0 : index
    %c0_7 = arith.constant 0 : index
    %3 = vector.load %arg4[%c0_5, %c0_6, %c0_7] : memref<2x16x32xf32, #tpu.memory_space<vmem>>, vector<2x16x32xf32>
    %4 = vector.extract_strided_slice %1 {offsets = [0, 0], sizes = [1, 16], strides = [1, 1]} : vector<2x16xf32> to vector<1x16xf32>
    %5 = vector.broadcast %4 : vector<1x16xf32> to vector<256x16xf32>
    %6 = arith.mulf %0, %5 : vector<256x16xf32>
    %7 = vector.extract_strided_slice %2 {offsets = [0, 0], sizes = [1, 16], strides = [1, 1]} : vector<2x16xf32> to vector<1x16xf32>
    %8 = vector.broadcast %7 : vector<1x16xf32> to vector<256x16xf32>
    %9 = arith.addf %6, %8 : vector<256x16xf32>
    %cst = arith.constant 0.000000e+00 : f32
    %10 = vector.broadcast %cst : f32 to vector<256x16xf32>
    %11 = arith.maximumf %9, %10 : vector<256x16xf32>
    %12 = vector.extract_strided_slice %1 {offsets = [1, 0], sizes = [1, 16], strides = [1, 1]} : vector<2x16xf32> to vector<1x16xf32>
    %13 = vector.broadcast %12 : vector<1x16xf32> to vector<256x16xf32>
    %14 = arith.mulf %0, %13 : vector<256x16xf32>
    %15 = vector.extract_strided_slice %2 {offsets = [1, 0], sizes = [1, 16], strides = [1, 1]} : vector<2x16xf32> to vector<1x16xf32>
    %16 = vector.broadcast %15 : vector<1x16xf32> to vector<256x16xf32>
    %17 = arith.addf %14, %16 : vector<256x16xf32>
    %cst_8 = arith.constant 0.000000e+00 : f32
    %18 = vector.broadcast %cst_8 : f32 to vector<256x16xf32>
    %19 = arith.maximumf %17, %18 : vector<256x16xf32>
    %20 = vector.extract_strided_slice %3 {offsets = [0, 0, 0], sizes = [1, 16, 32], strides = [1, 1, 1]} : vector<2x16x32xf32> to vector<1x16x32xf32>
    %21 = vector.shape_cast %20 : vector<1x16x32xf32> to vector<16x32xf32>
    %cst_9 = arith.constant dense<0.000000e+00> : vector<256x32xf32>
    %22 = tpu.matmul %11, %21, %cst_9 {dimension_numbers = #tpu.dot_dimension_numbers<[1], [0], [0], [1], [0, 0, 1, 1], [], []>} : vector<256x16xf32>, vector<16x32xf32>, vector<256x32xf32> -> vector<256x32xf32>
    %c0_10 = arith.constant 0 : index
    %c0_11 = arith.constant 0 : index
    %23 = vector.load %arg5[%c0_10, %c0_11] : memref<256x64xf32, #tpu.memory_space<vmem>>, vector<256x32xf32>
    tpu.vector_store %arg5[%c0_10, %c0_11], %22 {strides = array<i32>} : memref<256x64xf32, #tpu.memory_space<vmem>>, vector<256x32xf32>,
    %24 = vector.extract_strided_slice %3 {offsets = [1, 0, 0], sizes = [1, 16, 32], strides = [1, 1, 1]} : vector<2x16x32xf32> to vector<1x16x32xf32>
    %25 = vector.shape_cast %24 : vector<1x16x32xf32> to vector<16x32xf32>
    %cst_12 = arith.constant dense<0.000000e+00> : vector<256x32xf32>
    %26 = tpu.matmul %19, %25, %cst_12 {dimension_numbers = #tpu.dot_dimension_numbers<[1], [0], [0], [1], [0, 0, 1, 1], [], []>} : vector<256x16xf32>, vector<16x32xf32>, vector<256x32xf32> -> vector<256x32xf32>
    %c0_13 = arith.constant 0 : index
    %c32 = arith.constant 32 : index
    %27 = vector.load %arg5[%c0_13, %c32] : memref<256x64xf32, #tpu.memory_space<vmem>>, vector<256x32xf32>
    tpu.vector_store %arg5[%c0_13, %c32], %26 {strides = array<i32>} : memref<256x64xf32, #tpu.memory_space<vmem>>, vector<256x32xf32>,
    return
  }
  func.func @transform_0(%arg0: i32) -> (i32, i32) {
    %c0_i32 = arith.constant 0 : i32
    %c0_i32_0 = arith.constant 0 : i32
    return %arg0, %c0_i32 : i32, i32
  }
  func.func @transform_1(%arg0: i32) -> (i32, i32) {
    %c0_i32 = arith.constant 0 : i32
    %c0_i32_0 = arith.constant 0 : i32
    %c0_i32_1 = arith.constant 0 : i32
    return %c0_i32, %c0_i32_0 : i32, i32
  }
  func.func @transform_2(%arg0: i32) -> (i32, i32) {
    %c0_i32 = arith.constant 0 : i32
    %c0_i32_0 = arith.constant 0 : i32
    %c0_i32_1 = arith.constant 0 : i32
    return %c0_i32, %c0_i32_0 : i32, i32
  }
  func.func @transform_3(%arg0: i32) -> (i32, i32, i32) {
    %c0_i32 = arith.constant 0 : i32
    %c0_i32_0 = arith.constant 0 : i32
    %c0_i32_1 = arith.constant 0 : i32
    %c0_i32_2 = arith.constant 0 : i32
    return %c0_i32, %c0_i32_0, %c0_i32_1 : i32, i32, i32
  }
  func.func @transform_4(%arg0: i32) -> (i32, i32) {
    %c0_i32 = arith.constant 0 : i32
    %c0_i32_0 = arith.constant 0 : i32
    return %arg0, %c0_i32 : i32, i32
  }
}

</mosaic_0001>

<bundles_post_ra>
// kernel: tpu_custom_call.1
= control target key start
LH: loop header
LB: loop body
LE: loop exit
PB: predicated region body
PF: predicated region fallthrough
CT: control target
= control target key end

     0   :  { %vm251_vm0 = vcmask 130048   ;;  %vm461_vm1 = vcmask 261120   ;;  %vm831_vm2 = vcmask 523520   ;;  %s1701_s3 = inlined_call_operand.vmem [shape: f32[2,16,32], index: 3, kind: input, shape index: {}]   ;;  %s1702_s0 = inlined_call_operand.vmem [shape: f32[256,16], index: 0, kind: input, shape index: {}]   ;;  %s1703_s1 = inlined_call_operand.vmem [shape: f32[2,16], index: 1, kind: input, shape index: {}]   ;;  %s1704_s2 = inlined_call_operand.vmem [shape: f32[2,16], index: 2, kind: input, shape index: {}]   ;;  %s1705_s4 = inlined_call_operand.vmem [shape: f32[256,64], index: 4, kind: output, shape index: {}]  }
   0x1   :  { %v54_v0 = vld [vmem:[%s1701_s3 + $0x18] sm:$0xff]  ;;  %v53_v1 = vld [vmem:[%s1701_s3 + $0x10] sm:$0xff]  ;;  %v972_v2 = vld [vmem:[%s1702_s0] sm:$0xff] }
   0x2   :  { %604 = vmatpush.msra.mxu1 %v54_v0  ;;  %934 = vmatpush.msra.mxu3 %v54_v0  ;;  %v977_v3 = vld [vmem:[%s1703_s1] sm:$0x3]  ;;  %v998_v8 = vld [vmem:[%s1702_s0 + $0x8] sm:$0xff]  ;;  %v1022_v20 = vld [vmem:[%s1702_s0 + $0x10] sm:$0xff] }
   0x3   :  { %v982_v4 = vld [vmem:[%s1704_s2] sm:$0x3]  ;;  %v990_v6 = vperm.slane %v977_v3, 1  ;;  %v1003_v9 = vld [vmem:[%s1702_s0 + $0x88] sm:$0xff]  ;;  %v1027_v21 = vld [vmem:[%s1702_s0 + $0x90] sm:$0xff] }
   0x4   :  { %v987_v5 = vld [vmem:[%s1702_s0 + $0x80] sm:$0xff]  ;;  %v993_v7 = vperm.slane %v982_v4, 1  ;;  %605 = vmatpush.msra.mxu1 %v53_v1  ;;  %935 = vmatpush.msra.mxu3 %v53_v1  ;;  %v1040_v28 = vld [vmem:[%s1702_s0 + $0x18] sm:$0xff]  ;;  %v1076_v44 = vld [vmem:[%s1702_s0 + $0x28] sm:$0xff] }
   0x5   :  { %v154_v10 = vmul.f32 %v990_v6, %v972_v2  ;;  %v170_v11 = vmul.f32 %v990_v6, %v987_v5  ;;  %v155_v14 = vmul.f32 %v990_v6, %v998_v8  ;;  %v171_v15 = vmul.f32 %v990_v6, %v1003_v9  ;;  %v1045_v29 = vld [vmem:[%s1702_s0 + $0x98] sm:$0xff]  ;;  %v1058_v36 = vld [vmem:[%s1702_s0 + $0x20] sm:$0xff]  ;;  %v1081_v45 = vld [vmem:[%s1702_s0 + $0xa8] sm:$0xff] }
   0x6   :  { %v156_v24 = vmul.f32 %v990_v6, %v1022_v20  ;;  %v172_v25 = vmul.f32 %v990_v6, %v1027_v21  ;;  %v157_v32 = vmul.f32 %v990_v6, %v1040_v28  ;;  %v173_v33 = vmul.f32 %v990_v6, %v1045_v29  ;;  %v1063_v37 = vld [vmem:[%s1702_s0 + $0xa0] sm:$0xff]  ;;  %v1094_v52 = vld [vmem:[%s1702_s0 + $0x30] sm:$0xff]  ;;  %v1112_v60 = vld [vmem:[%s1702_s0 + $0x38] sm:$0xff] }
   0x7   :  { %v187_v12 = vadd.f32 %v993_v7, %v154_v10  ;;  %v203_v13 = vadd.f32 %v993_v7, %v170_v11  ;;  %v188_v18 = vadd.f32 %v993_v7, %v155_v14  ;;  %v204_v19 = vadd.f32 %v993_v7, %v171_v15  ;;  %v1099_v53 = vld [vmem:[%s1702_s0 + $0xb0] sm:$0xff]  ;;  %v1117_v61 = vld [vmem:[%s1702_s0 + $0xb8] sm:$0xff]  ;;  %v1138_v14 = vld [vmem:[%s1702_s0 + $0xc0] sm:$0xff] }
   0x8   :  { %v189_v26 = vadd.f32 %v993_v7, %v156_v24  ;;  %v205_v27 = vadd.f32 %v993_v7, %v172_v25  ;;  %v190_v34 = vadd.f32 %v993_v7, %v157_v32  ;;  %v206_v35 = vadd.f32 %v993_v7, %v173_v33 }
   0x9   :  { %v219_v16 = vmax.f32 %v187_v12, 0.0  ;;  %v235_v17 = vmax.f32 %v203_v13, 0.0  ;;  %v220_v22 = vmax.f32 %v188_v18, 0.0  ;;  %v236_v23 = vmax.f32 %v204_v19, 0.0  ;;  %v1130_v12 = vld [vmem:[%s1702_s0 + $0x40] sm:$0xff]  ;;  %v52_v13 = vld [vmem:[%s1701_s3 + $0x8] sm:$0xff] }
   0xa   :  { %v221_v30 = vmax.f32 %v189_v26, 0.0  ;;  %v237_v31 = vmax.f32 %v205_v27, 0.0  ;;  %v222_v38 = vmax.f32 %v190_v34, 0.0  ;;  %v238_v39 = vmax.f32 %v206_v35, 0.0  ;;  %362 = vmatpush.msra.mxu0 %v52_v13  ;;  %932 = vmatpush.msra.mxu2 %v52_v13 }
   0xb   :  { %900 = vmatmul.msk.f32.vlgmr.msra.gmra.mxu1 %vm251_vm0, %v219_v16  ;;  %916 = vmatmul.msk.f32.vlgmr.msra.gmra.mxu3 %vm251_vm0, %v235_v17  ;;  %v158_v40 = vmul.f32 %v990_v6, %v1058_v36  ;;  %v174_v41 = vmul.f32 %v990_v6, %v1063_v37  ;;  %v159_v48 = vmul.f32 %v990_v6, %v1076_v44  ;;  %v1141_v15 = vperm.slane %v977_v3, 0 }
   0xc   :  { %v175_v49 = vmul.f32 %v990_v6, %v1081_v45  ;;  %v160_v56 = vmul.f32 %v990_v6, %v1094_v52  ;;  %v176_v57 = vmul.f32 %v990_v6, %v1099_v53  ;;  %v161_v62 = vmul.f32 %v990_v6, %v1112_v60 }
   0xd   :  { %v191_v42 = vadd.f32 %v993_v7, %v158_v40  ;;  %v207_v43 = vadd.f32 %v993_v7, %v174_v41  ;;  %v192_v50 = vadd.f32 %v993_v7, %v159_v48  ;;  %v177_v1 = vmul.f32 %v990_v6, %v1117_v61 }
   0xe   :  { %v208_v51 = vadd.f32 %v993_v7, %v175_v49  ;;  %v193_v58 = vadd.f32 %v993_v7, %v160_v56  ;;  %v209_v59 = vadd.f32 %v993_v7, %v176_v57  ;;  %v194_v10 = vadd.f32 %v993_v7, %v161_v62 }
   0xf   :  { %v223_v46 = vmax.f32 %v191_v42, 0.0  ;;  %v239_v47 = vmax.f32 %v207_v43, 0.0  ;;  %v224_v54 = vmax.f32 %v192_v50, 0.0  ;;  %v210_v11 = vadd.f32 %v993_v7, %v177_v1  ;;  %v1191_v43 = vld [vmem:[%s1702_s0 + $0x50] sm:$0xff] }
  0x10   :  { %v240_v55 = vmax.f32 %v208_v51, 0.0  ;;  %v225_v63 = vmax.f32 %v193_v58, 0.0  ;;  %v241_v0 = vmax.f32 %v209_v59, 0.0  ;;  %v226_v16 = vmax.f32 %v194_v10, 0.0 }
  0x11   :  { %v162_v17 = vmul.f32 %v990_v6, %v1130_v12  ;;  %v242_v18 = vmax.f32 %v210_v11, 0.0  ;;  %v178_v19 = vmul.f32 %v990_v6, %v1138_v14  ;;  %v72_v3 = vmul.f32 %v1141_v15, %v987_v5  ;;  %v1171_v5 = vld [vmem:[%s1702_s0 + $0xc8] sm:$0xff] }
  0x12   :  { %v179_v35 = vmul.f32 %v990_v6, %v1171_v5  ;;  %v73_v40 = vmul.f32 %v1141_v15, %v1003_v9  ;;  %v1197_v9 = vld [vmem:[%s1702_s0 + $0xd0] sm:$0xff]  ;;  %v164_v48 = vmul.f32 %v990_v6, %v1191_v43  ;;  %v74_v56 = vmul.f32 %v1141_v15, %v1027_v21  ;;  %v1223_v21 = vld [vmem:[%s1702_s0 + $0xd8] sm:$0xff] }
  0x13   :  { %901 = vmatmul.msk.f32.gmra.mxu1 %vm251_vm0, %v220_v22  ;;  %917 = vmatmul.msk.f32.gmra.mxu3 %vm251_vm0, %v236_v23  ;;  %v56_v22 = vmul.f32 %v1141_v15, %v972_v2  ;;  %v1150_v23 = vperm.slane %v982_v4, 0  ;;  %v195_v25 = vadd.f32 %v993_v7, %v162_v17  ;;  %v211_v26 = vadd.f32 %v993_v7, %v178_v19  ;;  %v51_v2 = vld [vmem:[%s1701_s3] sm:$0xff] }
  0x14   :  { %363 = vmatpush.msra.mxu0 %v51_v2  ;;  %933 = vmatpush.msra.mxu2 %v51_v2  ;;  %v212_v42 = vadd.f32 %v993_v7, %v179_v35  ;;  %v180_v51 = vmul.f32 %v990_v6, %v1197_v9  ;;  %v197_v57 = vadd.f32 %v993_v7, %v164_v48 }
  0x15   :  { %v89_v24 = vadd.f32 %v1150_v23, %v56_v22  ;;  %v105_v4 = vadd.f32 %v1150_v23, %v72_v3  ;;  %v227_v32 = vmax.f32 %v195_v25, 0.0  ;;  %v243_v33 = vmax.f32 %v211_v26, 0.0  ;;  %v1243_v22 = vld [vmem:[%s1702_s0 + $0x60] sm:$0xff] }
  0x16   :  { %v244_v50 = vmax.f32 %v212_v42, 0.0  ;;  %v213_v58 = vadd.f32 %v993_v7, %v180_v51  ;;  %v107_v62 = vadd.f32 %v1150_v23, %v74_v56  ;;  %v181_v11 = vmul.f32 %v990_v6, %v1223_v21  ;;  %v1295_v51 = vld [vmem:[%s1702_s0 + $0x70] sm:$0xff] }
  0x17   :  { %v121_v27 = vmax.f32 %v89_v24, 0.0  ;;  %v59_v13 = vmul.f32 %v1141_v15, %v1040_v28  ;;  %v75_v17 = vmul.f32 %v1141_v15, %v1045_v29  ;;  %v1249_v29 = vld [vmem:[%s1702_s0 + $0xe0] sm:$0xff]  ;;  %v166_v25 = vmul.f32 %v990_v6, %v1243_v22 }
  0x18   :  { %v245_v1 = vmax.f32 %v213_v58, 0.0  ;;  %v214_v19 = vadd.f32 %v993_v7, %v181_v11  ;;  %v77_v48 = vmul.f32 %v1141_v15, %v1081_v45  ;;  %v1301_v45 = vld [vmem:[%s1702_s0 + $0xf0] sm:$0xff]  ;;  %v168_v56 = vmul.f32 %v990_v6, %v1295_v51 }
  0x19   :  { %868 = vmatmul.msk.f32.vlgmr.msra.gmra.mxu0 %vm251_vm0, %v121_v27  ;;  %v108_v28 = vadd.f32 %v1150_v23, %v75_v17  ;;  %v182_v27 = vmul.f32 %v990_v6, %v1249_v29 }
  0x1a   :  { %v246_v2 = vmax.f32 %v214_v19, 0.0 }
  0x1b   :  { %902 = vmatmul.msk.f32.gmra.mxu1 %vm251_vm0, %v221_v30  ;;  %918 = vmatmul.msk.f32.gmra.mxu3 %vm251_vm0, %v237_v31  ;;  %v1166_v30 = vld [vmem:[%s1702_s0 + $0x48] sm:$0xff]  ;;  %v137_v31 = vmax.f32 %v105_v4, 0.0  ;;  %v140_v3 = vmax.f32 %v108_v28, 0.0  ;;  %v60_v4 = vmul.f32 %v1141_v15, %v1058_v36  ;;  %v63_v28 = vmul.f32 %v1141_v15, %v1112_v60 }
  0x1c   :  { %v163_v34 = vmul.f32 %v990_v6, %v1166_v30  ;;  %v1270_v36 = vld [vmem:[%s1702_s0 + $0x68] sm:$0xff] }
  0x1d   :  { %884 = vmatmul.msk.f32.vlgmr.msra.gmra.mxu2 %vm251_vm0, %v137_v31  ;;  %v93_v31 = vadd.f32 %v1150_v23, %v60_v4  ;;  %v167_v42 = vmul.f32 %v990_v6, %v1270_v36 }
  0x1e   :  { %v196_v41 = vadd.f32 %v993_v7, %v163_v34  ;;  %v215_v34 = vadd.f32 %v993_v7, %v182_v27 }
  0x1f   :  { %v125_v35 = vmax.f32 %v93_v31, 0.0 }
  0x20   :  { %v228_v49 = vmax.f32 %v196_v41, 0.0  ;;  %v247_v41 = vmax.f32 %v215_v34, 0.0 }
  0x23   :  { %903 = vmatmul.msk.f32.gmra.mxu1 %vm251_vm0, %v222_v38  ;;  %919 = vmatmul.msk.f32.gmra.mxu3 %vm251_vm0, %v238_v39  ;;  %v57_v38 = vmul.f32 %v1141_v15, %v998_v8  ;;  %v106_v8 = vadd.f32 %v1150_v23, %v73_v40 }
  0x25   :  { %v90_v39 = vadd.f32 %v1150_v23, %v57_v38 }
  0x2b   :  { %904 = vmatmul.msk.f32.gmra.mxu1 %vm251_vm0, %v223_v46  ;;  %920 = vmatmul.msk.f32.gmra.mxu3 %vm251_vm0, %v239_v47  ;;  %v122_v46 = vmax.f32 %v90_v39, 0.0  ;;  %v138_v47 = vmax.f32 %v106_v8, 0.0  ;;  %v61_v8 = vmul.f32 %v1141_v15, %v1076_v44  ;;  %v110_v44 = vadd.f32 %v1150_v23, %v77_v48 }
  0x2d   :  { %869 = vmatmul.msk.f32.gmra.mxu0 %vm251_vm0, %v122_v46  ;;  %885 = vmatmul.msk.f32.gmra.mxu2 %vm251_vm0, %v138_v47  ;;  %v94_v47 = vadd.f32 %v1150_v23, %v61_v8 }
  0x33   :  { %905 = vmatmul.msk.f32.gmra.mxu1 %vm251_vm0, %v224_v54  ;;  %921 = vmatmul.msk.f32.gmra.mxu3 %vm251_vm0, %v240_v55  ;;  %v58_v54 = vmul.f32 %v1141_v15, %v1022_v20  ;;  %v1218_v20 = vld [vmem:[%s1702_s0 + $0x58] sm:$0xff] }
  0x34   :  { %v165_v10 = vmul.f32 %v990_v6, %v1218_v20 }
  0x35   :  { %v91_v55 = vadd.f32 %v1150_v23, %v58_v54  ;;  %v126_v54 = vmax.f32 %v94_v47, 0.0 }
  0x37   :  { %v123_v59 = vmax.f32 %v91_v55, 0.0  ;;  %v142_v55 = vmax.f32 %v110_v44, 0.0 }
  0x39   :  { %870 = vmatmul.msk.f32.gmra.mxu0 %vm251_vm0, %v123_v59  ;;  %v184_v59 = vmul.f32 %v990_v6, %v1301_v45 }
  0x3b   :  { %906 = vmatmul.msk.f32.gmra.mxu1 %vm251_vm0, %v225_v63  ;;  %922 = vmatmul.msk.f32.gmra.mxu3 %vm251_vm0, %v241_v0  ;;  %v139_v63 = vmax.f32 %v107_v62, 0.0  ;;  %v229_v0 = vmax.f32 %v197_v57, 0.0  ;;  %v62_v62 = vmul.f32 %v1141_v15, %v1094_v52  ;;  %v1322_v52 = vld [vmem:[%s1702_s0 + $0x78] sm:$0xff] }
  0x3c   :  { %v169_v19 = vmul.f32 %v990_v6, %v1322_v52 }
  0x3d   :  { %886 = vmatmul.msk.f32.gmra.mxu2 %vm251_vm0, %v139_v63  ;;  %v95_v63 = vadd.f32 %v1150_v23, %v62_v62 }
  0x3f   :  { %v127_v11 = vmax.f32 %v95_v63, 0.0 }
  0x43   :  { %907 = vmatmul.msk.f32.gmra.mxu1 %vm251_vm0, %v226_v16  ;;  %923 = vmatmul.msk.f32.gmra.mxu3 %vm251_vm0, %v242_v18  ;;  %v92_v16 = vadd.f32 %v1150_v23, %v59_v13  ;;  %v198_v18 = vadd.f32 %v993_v7, %v165_v10  ;;  %v217_v10 = vadd.f32 %v993_v7, %v184_v59 }
  0x45   :  { %v124_v24 = vmax.f32 %v92_v16, 0.0  ;;  %v230_v26 = vmax.f32 %v198_v18, 0.0  ;;  %887 = vmatmul.msk.f32.gmra.mxu2 %vm251_vm0, %v140_v3  ;;  %v249_v18 = vmax.f32 %v217_v10, 0.0  ;;  %v96_v3 = vadd.f32 %v1150_v23, %v63_v28 }
  0x47   :  { %871 = vmatmul.msk.f32.gmra.mxu0 %vm251_vm0, %v124_v24  ;;  %v128_v27 = vmax.f32 %v96_v3, 0.0 }
  0x4b   :  { %908 = vmatmul.msk.f32.gmra.mxu1 %vm251_vm0, %v227_v32  ;;  %924 = vmatmul.msk.f32.gmra.mxu3 %vm251_vm0, %v243_v33  ;;  %v76_v32 = vmul.f32 %v1141_v15, %v1063_v37  ;;  %v199_v33 = vadd.f32 %v993_v7, %v166_v25  ;;  %v1275_v37 = vld [vmem:[%s1702_s0 + $0xe8] sm:$0xff]  ;;  %v79_v25 = vmul.f32 %v1141_v15, %v1117_v61 }
  0x4c   :  { %v183_v46 = vmul.f32 %v990_v6, %v1275_v37  ;;  %v64_v61 = vmul.f32 %v1141_v15, %v1130_v12  ;;  %v65_v12 = vmul.f32 %v1141_v15, %v1166_v30  ;;  %v66_v30 = vmul.f32 %v1141_v15, %v1191_v43 }
  0x4d   :  { %v109_v38 = vadd.f32 %v1150_v23, %v76_v32  ;;  %v231_v40 = vmax.f32 %v199_v33, 0.0  ;;  %v80_v33 = vmul.f32 %v1141_v15, %v1138_v14  ;;  %v67_v43 = vmul.f32 %v1141_v15, %v1218_v20 }
  0x4e   :  { %v97_v32 = vadd.f32 %v1150_v23, %v64_v61  ;;  %v98_v14 = vadd.f32 %v1150_v23, %v65_v12  ;;  %v99_v47 = vadd.f32 %v1150_v23, %v66_v30  ;;  %v83_v20 = vmul.f32 %v1141_v15, %v1223_v21 }
  0x4f   :  { %872 = vmatmul.msk.f32.gmra.mxu0 %vm251_vm0, %v125_v35  ;;  %v141_v39 = vmax.f32 %v109_v38, 0.0  ;;  %v113_v34 = vadd.f32 %v1150_v23, %v80_v33  ;;  %v84_v21 = vmul.f32 %v1141_v15, %v1249_v29  ;;  %v85_v29 = vmul.f32 %v1141_v15, %v1275_v37 }
  0x50   :  { %v131_v48 = vmax.f32 %v99_v47, 0.0  ;;  %v116_v63 = vadd.f32 %v1150_v23, %v83_v20 }
  0x51   :  { %888 = vmatmul.msk.f32.gmra.mxu2 %vm251_vm0, %v141_v39  ;;  %v145_v35 = vmax.f32 %v113_v34, 0.0  ;;  %v81_v39 = vmul.f32 %v1141_v15, %v1171_v5  ;;  %v82_v5 = vmul.f32 %v1141_v15, %v1197_v9  ;;  %v118_v3 = vadd.f32 %v1150_v23, %v85_v29 }
  0x53   :  { %909 = vmatmul.msk.f32.gmra.mxu1 %vm251_vm0, %v228_v49  ;;  %925 = vmatmul.msk.f32.gmra.mxu3 %vm251_vm0, %v244_v50  ;;  %v200_v49 = vadd.f32 %v993_v7, %v167_v42  ;;  %v216_v50 = vadd.f32 %v993_v7, %v183_v46 }
  0x55   :  { %v232_v57 = vmax.f32 %v200_v49, 0.0  ;;  %v248_v58 = vmax.f32 %v216_v50, 0.0  ;;  %v115_v49 = vadd.f32 %v1150_v23, %v82_v5 }
  0x57   :  { %873 = vmatmul.msk.f32.gmra.mxu0 %vm251_vm0, %v126_v54  ;;  %v147_v50 = vmax.f32 %v115_v49, 0.0 }
  0x59   :  { %889 = vmatmul.msk.f32.gmra.mxu2 %vm251_vm0, %v142_v55  ;;  %v100_v55 = vadd.f32 %v1150_v23, %v67_v43 }
  0x5b   :  { %910 = vmatmul.msk.f32.gmra.mxu1 %vm251_vm0, %v229_v0  ;;  %926 = vmatmul.msk.f32.gmra.mxu3 %vm251_vm0, %v245_v1  ;;  %v78_v0 = vmul.f32 %v1141_v15, %v1099_v53  ;;  %v201_v1 = vadd.f32 %v993_v7, %v168_v56  ;;  %v1327_v53 = vld [vmem:[%s1702_s0 + $0xf8] sm:$0xff]  ;;  %s937_s0 = smov 32   ;;  %v132_v9 = vmax.f32 %v100_v55, 0.0 }
  0x5c   :  { %v185_v24 = vmul.f32 %v990_v6, %v1327_v53  ;;  %v112_v6 = vadd.f32 %v1150_v23, %v79_v25  ;;  %v150_v25 = vmax.f32 %v118_v3, 0.0  ;;  %v87_v12 = vmul.f32 %v1141_v15, %v1327_v53 }
  0x5d   :  { %v111_v13 = vadd.f32 %v1150_v23, %v78_v0  ;;  %v233_v17 = vmax.f32 %v201_v1, 0.0  ;;  %v148_v0 = vmax.f32 %v116_v63, 0.0 }
  0x5e   :  { %v144_v4 = vmax.f32 %v112_v6, 0.0 }
  0x5f   :  { %874 = vmatmul.msk.f32.gmra.mxu0 %vm251_vm0, %v127_v11  ;;  %v143_v16 = vmax.f32 %v111_v13, 0.0 }
  0x61   :  { %890 = vmatmul.msk.f32.gmra.mxu2 %vm251_vm0, %v143_v16  ;;  %v117_v16 = vadd.f32 %v1150_v23, %v84_v21 }
  0x63   :  { %911 = vmatmul.msk.f32.gmra.mxu1 %vm251_vm0, %v230_v26  ;;  %927 = vmatmul.msk.f32.gmra.mxu3 %vm251_vm0, %v246_v2  ;;  %v202_v26 = vadd.f32 %v993_v7, %v169_v19  ;;  %v218_v2 = vadd.f32 %v993_v7, %v185_v24  ;;  %v129_v7 = vmax.f32 %v97_v32, 0.0 }
  0x65   :  { %v234_v60 = vmax.f32 %v202_v26, 0.0  ;;  %v250_v31 = vmax.f32 %v218_v2, 0.0 }
  0x67   :  { %875 = vmatmul.msk.f32.gmra.mxu0 %vm251_vm0, %v128_v27 }
  0x69   :  { %891 = vmatmul.msk.f32.gmra.mxu2 %vm251_vm0, %v144_v4 }
  0x6b   :  { %912 = vmatmul.msk.f32.gmra.mxu1 %vm251_vm0, %v231_v40  ;;  %928 = vmatmul.msk.f32.gmra.mxu3 %vm251_vm0, %v247_v41  ;;  %v130_v40 = vmax.f32 %v98_v14, 0.0  ;;  %v114_v41 = vadd.f32 %v1150_v23, %v81_v39 }
  0x6d   :  { %v146_v42 = vmax.f32 %v114_v41, 0.0 }
  0x6f   :  { %876 = vmatmul.msk.f32.gmra.mxu0 %vm251_vm0, %v129_v7 }
  0x71   :  { %892 = vmatmul.msk.f32.gmra.mxu2 %vm251_vm0, %v145_v35 }
  0x73   :  { %913 = vmatmul.msk.f32.gmra.mxu1 %vm251_vm0, %v232_v57  ;;  %929 = vmatmul.msk.f32.gmra.mxu3 %vm251_vm0, %v248_v58  ;;  %v68_v57 = vmul.f32 %v1141_v15, %v1243_v22  ;;  %v69_v22 = vmul.f32 %v1141_v15, %v1270_v36  ;;  %v70_v36 = vmul.f32 %v1141_v15, %v1295_v51 }
  0x75   :  { %v101_v59 = vadd.f32 %v1150_v23, %v68_v57  ;;  %v102_v11 = vadd.f32 %v1150_v23, %v69_v22  ;;  %v103_v24 = vadd.f32 %v1150_v23, %v70_v36 }
  0x77   :  { %877 = vmatmul.msk.f32.gmra.mxu0 %vm251_vm0, %v130_v40  ;;  %v133_v62 = vmax.f32 %v101_v59, 0.0  ;;  %v134_v13 = vmax.f32 %v102_v11, 0.0  ;;  %v135_v28 = vmax.f32 %v103_v24, 0.0  ;;  %v120_v40 = vadd.f32 %v1150_v23, %v87_v12 }
  0x79   :  { %893 = vmatmul.msk.f32.gmra.mxu2 %vm251_vm0, %v146_v42 }
  0x7b   :  { %914 = vmatmul.msk.f32.gmra.mxu1 %vm251_vm0, %v233_v17  ;;  %930 = vmatmul.msk.f32.gmra.mxu3 %vm251_vm0, %v249_v18  ;;  %v149_v17 = vmax.f32 %v117_v16, 0.0 }
  0x7f   :  { %878 = vmatmul.msk.f32.gmra.mxu0 %vm251_vm0, %v131_v48 }
  0x81   :  { %894 = vmatmul.msk.f32.gmra.mxu2 %vm251_vm0, %v147_v50 }
  0x83   :  { %915 = vmatmul.msk.f32.gmra.mxu1 %vm251_vm0, %v234_v60  ;;  %931 = vmatmul.msk.f32.gmra.mxu3 %vm251_vm0, %v250_v31  ;;  %v86_v60 = vmul.f32 %v1141_v15, %v1301_v45  ;;  %v71_v45 = vmul.f32 %v1141_v15, %v1322_v52  ;;  %v152_v52 = vmax.f32 %v120_v40, 0.0 }
  0x85   :  { %v119_v32 = vadd.f32 %v1150_v23, %v86_v60  ;;  %v104_v35 = vadd.f32 %v1150_v23, %v71_v45 }
  0x87   :  { %879 = vmatmul.msk.f32.gmra.mxu0 %vm251_vm0, %v132_v9  ;;  %v151_v33 = vmax.f32 %v119_v32, 0.0  ;;  %v136_v39 = vmax.f32 %v104_v35, 0.0 }
  0x88   :  { %v607_v38 = vpop.f32.mrf.mxu1 }
  0x89   :  { %735 = vrot.lane.b32.xlu0 %v607_v38, %s937_s0  ;;  %895 = vmatmul.msk.f32.gmra.mxu2 %vm251_vm0, %v148_v0 }
  0x8e   :  { %v655_v46 = vpop.f32.mrf.mxu3 }
  0x8f   :  { %767 = vrot.lane.b32.xlu1 %v655_v46, %s937_s0  ;;  %880 = vmatmul.msk.f32.gmra.mxu0 %vm251_vm0, %v133_v62 }
  0x90   :  { %v610_v8 = vpop.f32.mrf.mxu1 }
  0x91   :  { %737 = vrot.lane.b32.xlu0 %v610_v8, %s937_s0  ;;  %896 = vmatmul.msk.f32.gmra.mxu2 %vm251_vm0, %v149_v17 }
  0x96   :  { %v658_v54 = vpop.f32.mrf.mxu3  ;;  %v365_v27 = vpop.f32.mrf.mxu0 }
  0x97   :  { %769 = vrot.lane.b32.xlu2 %v658_v54, %s937_s0  ;;  %881 = vmatmul.msk.f32.gmra.mxu0 %vm251_vm0, %v134_v13  ;;  %462 = vst.msk [vmem:[%s1705_s4] sm:$0xff] %vm461_vm1, %v365_v27 }
  0x98   :  { %v613_v44 = vpop.f32.mrf.mxu1 }
  0x99   :  { %739 = vrot.lane.b32.xlu1 %v613_v44, %s937_s0  ;;  %897 = vmatmul.msk.f32.gmra.mxu2 %vm251_vm0, %v150_v25 }
  0x9e   :  { %v661_v56 = vpop.f32.mrf.mxu3 }
  0x9f   :  { %771 = vrot.lane.b32.xlu0 %v661_v56, %s937_s0  ;;  %882 = vmatmul.msk.f32.gmra.mxu0 %vm251_vm0, %v135_v28 }
  0xa0   :  { %v616_v58 = vpop.f32.mrf.mxu1  ;;  %v413_v61 = vpop.f32.mrf.mxu2 }
  0xa1   :  { %741 = vrot.lane.b32.xlu1 %v616_v58, %s937_s0  ;;  %478 = vst.msk [vmem:[%s1705_s4 + $0x80] sm:$0xff] %vm461_vm1, %v413_v61  ;;  %898 = vmatmul.msk.f32.gmra.mxu2 %vm251_vm0, %v151_v33 }
  0xa6   :  { %v664_v1 = vpop.f32.mrf.mxu3 }
  0xa7   :  { %883 = vmatmul.msk.f32.gmra.mxu0 %vm251_vm0, %v136_v39 }
  0xa8   :  { %v619_v10 = vpop.f32.mrf.mxu1 }
  0xa9   :  { %773 = vrot.lane.b32.xlu1 %v664_v1, %s937_s0  ;;  %743 = vrot.lane.b32.xlu2 %v619_v10, %s937_s0 }
  0xaa   :  { %v368_v31 = vpop.f32.mrf.mxu0  ;;  %899 = vmatmul.msk.f32.gmra.mxu2 %vm251_vm0, %v152_v52 }
  0xab   :  { %463 = vst.msk [vmem:[%s1705_s4 + $0x8] sm:$0xff] %vm461_vm1, %v368_v31 }
  0xae   :  { %v667_v18 = vpop.f32.mrf.mxu3 }
  0xb0   :  { %v622_v19 = vpop.f32.mrf.mxu1  ;;  %v416_v14 = vpop.f32.mrf.mxu2 }
  0xb1   :  { %775 = vrot.lane.b32.xlu2 %v667_v18, %s937_s0  ;;  %479 = vst.msk [vmem:[%s1705_s4 + $0x88] sm:$0xff] %vm461_vm1, %v416_v14 }
  0xb6   :  { %v670_v26 = vpop.f32.mrf.mxu3  ;;  %v371_v38 = vpop.f32.mrf.mxu0 }
  0xb7   :  { %777 = vrot.lane.b32.xlu0 %v670_v26, %s937_s0  ;;  %464 = vst.msk [vmem:[%s1705_s4 + $0x10] sm:$0xff] %vm461_vm1, %v371_v38 }
  0xb8   :  { %v625_v51 = vpop.f32.mrf.mxu1 }
  0xb9   :  { %745 = vrot.lane.b32.xlu2 %v622_v19, %s937_s0 }
  0xbe   :  { %v673_v2 = vpop.f32.mrf.mxu3 }
  0xbf   :  { %779 = vrot.lane.b32.xlu1 %v673_v2, %s937_s0  ;;  %747 = vrot.lane.b32.xlu0 %v625_v51, %s937_s0 }
  0xc0   :  { %v628_v37 = vpop.f32.mrf.mxu1  ;;  %v419_v42 = vpop.f32.mrf.mxu2 }
  0xc1   :  { %480 = vst.msk [vmem:[%s1705_s4 + $0x90] sm:$0xff] %vm461_vm1, %v419_v42 }
  0xc4   :  { %v374_v53 = vpop.f32.mrf.mxu0 }
  0xc5   :  { %465 = vst.msk [vmem:[%s1705_s4 + $0x18] sm:$0xff] %vm461_vm1, %v374_v53 }
  0xc6   :  { %v676_v6 = vpop.f32.mrf.mxu3 }
  0xc7   :  { %781 = vrot.lane.b32.xlu2 %v676_v6, %s937_s0  ;;  %749 = vrot.lane.b32.xlu1 %v628_v37, %s937_s0 }
  0xc8   :  { %v631_v4 = vpop.f32.mrf.mxu1  ;;  %v422_v8 = vpop.f32.mrf.mxu2 }
  0xc9   :  { %481 = vst.msk [vmem:[%s1705_s4 + $0x98] sm:$0xff] %vm461_vm1, %v422_v8 }
  0xcc   :  { %v377_v30 = vpop.f32.mrf.mxu0 }
  0xcd   :  { %466 = vst.msk [vmem:[%s1705_s4 + $0x20] sm:$0xff] %vm461_vm1, %v377_v30 }
  0xce   :  { %v679_v7 = vpop.f32.mrf.mxu3 }
  0xcf   :  { %783 = vrot.lane.b32.xlu0 %v679_v7, %s937_s0  ;;  %751 = vrot.lane.b32.xlu2 %v631_v4, %s937_s0 }
  0xd0   :  { %v634_v34 = vpop.f32.mrf.mxu1 }
  0xd4   :  { %v380_v48 = vpop.f32.mrf.mxu0  ;;  %v425_v49 = vpop.f32.mrf.mxu2 }
  0xd5   :  { %467 = vst.msk [vmem:[%s1705_s4 + $0x28] sm:$0xff] %vm461_vm1, %v380_v48 }
  0xd6   :  { %v682_v41 = vpop.f32.mrf.mxu3  ;;  %482 = vst.msk [vmem:[%s1705_s4 + $0xa0] sm:$0xff] %vm461_vm1, %v425_v49 }
  0xd7   :  { %785 = vrot.lane.b32.xlu1 %v682_v41, %s937_s0  ;;  %753 = vrot.lane.b32.xlu0 %v634_v34, %s937_s0 }
  0xd8   :  { %v637_v15 = vpop.f32.mrf.mxu1 }
  0xdc   :  { %v383_v44 = vpop.f32.mrf.mxu0  ;;  %v428_v55 = vpop.f32.mrf.mxu2 }
  0xdd   :  { %468 = vst.msk [vmem:[%s1705_s4 + $0x30] sm:$0xff] %vm461_vm1, %v383_v44 }
  0xde   :  { %v685_v23 = vpop.f32.mrf.mxu3  ;;  %483 = vst.msk [vmem:[%s1705_s4 + $0xa8] sm:$0xff] %vm461_vm1, %v428_v55 }
  0xdf   :  { %787 = vrot.lane.b32.xlu2 %v685_v23, %s937_s0  ;;  %755 = vrot.lane.b32.xlu1 %v637_v15, %s937_s0 }
  0xe0   :  { %v640_v46 = vpop.f32.mrf.mxu1 }
  0xe4   :  { %v386_v57 = vpop.f32.mrf.mxu0  ;;  %v431_v58 = vpop.f32.mrf.mxu2 }
  0xe5   :  { %469 = vst.msk [vmem:[%s1705_s4 + $0x38] sm:$0xff] %vm461_vm1, %v386_v57 }
  0xe6   :  { %v688_v47 = vpop.f32.mrf.mxu3  ;;  %484 = vst.msk [vmem:[%s1705_s4 + $0xb0] sm:$0xff] %vm461_vm1, %v431_v58 }
  0xe7   :  { %789 = vrot.lane.b32.xlu0 %v688_v47, %s937_s0  ;;  %757 = vrot.lane.b32.xlu2 %v640_v46, %s937_s0 }
  0xe8   :  { %v643_v5 = vpop.f32.mrf.mxu1 }
  0xec   :  { %v389_v0 = vpop.f32.mrf.mxu0  ;;  %v434_v1 = vpop.f32.mrf.mxu2 }
  0xed   :  { %470 = vst.msk [vmem:[%s1705_s4 + $0x40] sm:$0xff] %vm461_vm1, %v389_v0 }
  0xee   :  { %v691_v50 = vpop.f32.mrf.mxu3  ;;  %485 = vst.msk [vmem:[%s1705_s4 + $0xb8] sm:$0xff] %vm461_vm1, %v434_v1 }
  0xef   :  { %791 = vrot.lane.b32.xlu1 %v691_v50, %s937_s0  ;;  %759 = vrot.lane.b32.xlu0 %v643_v5, %s937_s0 }
  0xf0   :  { %v646_v54 = vpop.f32.mrf.mxu1 }
  0xf1   :  { %v770_v43 = vpop.permute.xlu2 %769 }
  0xf2   :  { %849 = vst.msk [vmem:[%s1705_s4 + $0x88] sm:$0xff] %vm831_vm2, %v770_v43 }
  0xf4   :  { %v392_v16 = vpop.f32.mrf.mxu0  ;;  %v437_v17 = vpop.f32.mrf.mxu2 }
  0xf5   :  { %471 = vst.msk [vmem:[%s1705_s4 + $0x48] sm:$0xff] %vm461_vm1, %v392_v16 }
  0xf6   :  { %v694_v9 = vpop.f32.mrf.mxu3  ;;  %486 = vst.msk [vmem:[%s1705_s4 + $0xc0] sm:$0xff] %vm461_vm1, %v437_v17 }
  0xf7   :  { %761 = vrot.lane.b32.xlu1 %v646_v54, %s937_s0 }
  0xf8   :  { %v649_v56 = vpop.f32.mrf.mxu1 }
  0xf9   :  { %763 = vrot.lane.b32.xlu2 %v649_v56, %s937_s0 }
  0xfb   :  { %v736_v59 = vpop.permute.xlu0 %735 }
  0xfc   :  { %832 = vst.msk [vmem:[%s1705_s4] sm:$0xff] %vm831_vm2, %v736_v59  ;;  %v395_v24 = vpop.f32.mrf.mxu0  ;;  %v440_v29 = vpop.f32.mrf.mxu2 }
  0xfd   :  { %472 = vst.msk [vmem:[%s1705_s4 + $0x50] sm:$0xff] %vm461_vm1, %v395_v24 }
  0xfe   :  { %v697_v20 = vpop.f32.mrf.mxu3  ;;  %487 = vst.msk [vmem:[%s1705_s4 + $0xc8] sm:$0xff] %vm461_vm1, %v440_v29 }
 0x100   :  { %v652_v62 = vpop.f32.mrf.mxu1 }
 0x101   :  { %793 = vrot.lane.b32.xlu2 %v694_v9, %s937_s0  ;;  %765 = vrot.lane.b32.xlu0 %v652_v62, %s937_s0  ;;  %v768_v63 = vpop.permute.xlu1 %767 }
 0x102   :  { %848 = vst.msk [vmem:[%s1705_s4 + $0x80] sm:$0xff] %vm831_vm2, %v768_v63 }
 0x103   :  { %v738_v22 = vpop.permute.xlu0 %737  ;;  %v744_v10 = vpop.permute.xlu2 %743 }
 0x104   :  { %833 = vst.msk [vmem:[%s1705_s4 + $0x8] sm:$0xff] %vm831_vm2, %v738_v22  ;;  %v398_v3 = vpop.f32.mrf.mxu0  ;;  %v443_v25 = vpop.f32.mrf.mxu2 }
 0x105   :  { %836 = vst.msk [vmem:[%s1705_s4 + $0x20] sm:$0xff] %vm831_vm2, %v744_v10 }
 0x106   :  { %v700_v11 = vpop.f32.mrf.mxu3  ;;  %473 = vst.msk [vmem:[%s1705_s4 + $0x58] sm:$0xff] %vm461_vm1, %v398_v3 }
 0x107   :  { %797 = vrot.lane.b32.xlu1 %v700_v11, %s937_s0  ;;  %488 = vst.msk [vmem:[%s1705_s4 + $0xd0] sm:$0xff] %vm461_vm1, %v443_v25 }
 0x109   :  { %795 = vrot.lane.b32.xlu0 %v697_v20, %s937_s0 }
 0x10b   :  { %v740_v21 = vpop.permute.xlu1 %739  ;;  %v776_v13 = vpop.permute.xlu2 %775 }
 0x10c   :  { %834 = vst.msk [vmem:[%s1705_s4 + $0x10] sm:$0xff] %vm831_vm2, %v740_v21  ;;  %v401_v51 = vpop.f32.mrf.mxu0  ;;  %v446_v27 = vpop.f32.mrf.mxu2 }
 0x10d   :  { %852 = vst.msk [vmem:[%s1705_s4 + $0xa0] sm:$0xff] %vm831_vm2, %v776_v13 }
 0x10e   :  { %474 = vst.msk [vmem:[%s1705_s4 + $0x60] sm:$0xff] %vm461_vm1, %v401_v51 }
 0x10f   :  { %489 = vst.msk [vmem:[%s1705_s4 + $0xd8] sm:$0xff] %vm461_vm1, %v446_v27 }
 0x111   :  { %v772_v18 = vpop.permute.xlu0 %771 }
 0x112   :  { %850 = vst.msk [vmem:[%s1705_s4 + $0x90] sm:$0xff] %vm831_vm2, %v772_v18 }
 0x113   :  { %v742_v36 = vpop.permute.xlu1 %741  ;;  %v746_v19 = vpop.permute.xlu2 %745 }
 0x114   :  { %835 = vst.msk [vmem:[%s1705_s4 + $0x18] sm:$0xff] %vm831_vm2, %v742_v36  ;;  %v404_v6 = vpop.f32.mrf.mxu0  ;;  %v449_v31 = vpop.f32.mrf.mxu2 }
 0x115   :  { %837 = vst.msk [vmem:[%s1705_s4 + $0x28] sm:$0xff] %vm831_vm2, %v746_v19 }
 0x116   :  { %475 = vst.msk [vmem:[%s1705_s4 + $0x68] sm:$0xff] %vm461_vm1, %v404_v6 }
 0x117   :  { %490 = vst.msk [vmem:[%s1705_s4 + $0xe0] sm:$0xff] %vm461_vm1, %v449_v31 }
 0x11b   :  { %v774_v28 = vpop.permute.xlu1 %773 }
 0x11c   :  { %851 = vst.msk [vmem:[%s1705_s4 + $0x98] sm:$0xff] %vm831_vm2, %v774_v28  ;;  %v407_v61 = vpop.f32.mrf.mxu0  ;;  %v452_v7 = vpop.f32.mrf.mxu2 }
 0x11d   :  { %476 = vst.msk [vmem:[%s1705_s4 + $0x70] sm:$0xff] %vm461_vm1, %v407_v61 }
 0x11e   :  { %491 = vst.msk [vmem:[%s1705_s4 + $0xe8] sm:$0xff] %vm461_vm1, %v452_v7 }
 0x121   :  { %v782_v26 = vpop.permute.xlu2 %781 }
 0x122   :  { %855 = vst.msk [vmem:[%s1705_s4 + $0xb8] sm:$0xff] %vm831_vm2, %v782_v26 }
 0x124   :  { %v410_v14 = vpop.f32.mrf.mxu0  ;;  %v455_v40 = vpop.f32.mrf.mxu2 }
 0x125   :  { %477 = vst.msk [vmem:[%s1705_s4 + $0x78] sm:$0xff] %vm461_vm1, %v410_v14 }
 0x126   :  { %492 = vst.msk [vmem:[%s1705_s4 + $0xf0] sm:$0xff] %vm461_vm1, %v455_v40 }
 0x129   :  { %v778_v2 = vpop.permute.xlu0 %777  ;;  %v752_v37 = vpop.permute.xlu2 %751 }
 0x12a   :  { %853 = vst.msk [vmem:[%s1705_s4 + $0xa8] sm:$0xff] %vm831_vm2, %v778_v2 }
 0x12b   :  { %840 = vst.msk [vmem:[%s1705_s4 + $0x40] sm:$0xff] %vm831_vm2, %v752_v37 }
 0x12d   :  { %v458_v15 = vpop.f32.mrf.mxu2 }
 0x12e   :  { %493 = vst.msk [vmem:[%s1705_s4 + $0xf8] sm:$0xff] %vm461_vm1, %v458_v15 }
 0x131   :  { %v780_v4 = vpop.permute.xlu1 %779  ;;  %v748_v60 = vpop.permute.xlu0 %747 }
 0x132   :  { %854 = vst.msk [vmem:[%s1705_s4 + $0xb0] sm:$0xff] %vm831_vm2, %v780_v4 }
 0x133   :  { %838 = vst.msk [vmem:[%s1705_s4 + $0x30] sm:$0xff] %vm831_vm2, %v748_v60 }
 0x139   :  { %v750_v32 = vpop.permute.xlu1 %749  ;;  %v788_v33 = vpop.permute.xlu2 %787 }
 0x13a   :  { %839 = vst.msk [vmem:[%s1705_s4 + $0x38] sm:$0xff] %vm831_vm2, %v750_v32 }
 0x13b   :  { %858 = vst.msk [vmem:[%s1705_s4 + $0xd0] sm:$0xff] %vm831_vm2, %v788_v33 }
 0x141   :  { %v784_v45 = vpop.permute.xlu0 %783  ;;  %v758_v34 = vpop.permute.xlu2 %757 }
 0x142   :  { %856 = vst.msk [vmem:[%s1705_s4 + $0xc0] sm:$0xff] %vm831_vm2, %v784_v45 }
 0x143   :  { %843 = vst.msk [vmem:[%s1705_s4 + $0x58] sm:$0xff] %vm831_vm2, %v758_v34 }
 0x149   :  { %v786_v35 = vpop.permute.xlu1 %785  ;;  %v754_v12 = vpop.permute.xlu0 %753 }
 0x14a   :  { %857 = vst.msk [vmem:[%s1705_s4 + $0xc8] sm:$0xff] %vm831_vm2, %v786_v35 }
 0x14b   :  { %841 = vst.msk [vmem:[%s1705_s4 + $0x48] sm:$0xff] %vm831_vm2, %v754_v12 }
 0x151   :  { %v756_v38 = vpop.permute.xlu1 %755 }
 0x152   :  { %842 = vst.msk [vmem:[%s1705_s4 + $0x50] sm:$0xff] %vm831_vm2, %v756_v38 }
 0x153   :  { %v764_v39 = vpop.permute.xlu2 %763 }
 0x154   :  { %846 = vst.msk [vmem:[%s1705_s4 + $0x70] sm:$0xff] %vm831_vm2, %v764_v39 }
 0x159   :  { %v790_v52 = vpop.permute.xlu0 %789 }
 0x15a   :  { %859 = vst.msk [vmem:[%s1705_s4 + $0xd8] sm:$0xff] %vm831_vm2, %v790_v52 }
 0x15b   :  { %v794_v41 = vpop.permute.xlu2 %793 }
 0x15c   :  { %861 = vst.msk [vmem:[%s1705_s4 + $0xe8] sm:$0xff] %vm831_vm2, %v794_v41 }
 0x161   :  { %v792_v53 = vpop.permute.xlu1 %791  ;;  %v760_v42 = vpop.permute.xlu0 %759 }
 0x162   :  { %860 = vst.msk [vmem:[%s1705_s4 + $0xe0] sm:$0xff] %vm831_vm2, %v792_v53 }
 0x163   :  { %844 = vst.msk [vmem:[%s1705_s4 + $0x60] sm:$0xff] %vm831_vm2, %v760_v42 }
 0x169   :  { %v762_v23 = vpop.permute.xlu1 %761 }
 0x16a   :  { %845 = vst.msk [vmem:[%s1705_s4 + $0x68] sm:$0xff] %vm831_vm2, %v762_v23 }
 0x173   :  { %v766_v46 = vpop.permute.xlu0 %765 }
 0x174   :  { %847 = vst.msk [vmem:[%s1705_s4 + $0x78] sm:$0xff] %vm831_vm2, %v766_v46 }
 0x179   :  { %v798_v30 = vpop.permute.xlu1 %797 }
 0x17a   :  { %863 = vst.msk [vmem:[%s1705_s4 + $0xf8] sm:$0xff] %vm831_vm2, %v798_v30 }
 0x17b   :  { %v796_v8 = vpop.permute.xlu0 %795 }
 0x17c   :  { %862 = vst.msk [vmem:[%s1705_s4 + $0xf0] sm:$0xff] %vm831_vm2, %v796_v8 }

</bundles_post_ra>
